<compile_context>
chip_gen: v5e
topology: v5e:2x2
jax: 0.10.0
libtpu: 0.0.40
codegen_flags: <defaults>
</compile_context>

<pallas_src>
import jax
import jax.numpy as jnp
from jax.experimental import pallas as pl
from jax.experimental.pallas import tpu as pltpu


def _round_up(n, m):
    return ((n + m - 1) // m) * m


_MAX_BLOCK_B = 512          # biggest batch tile (well under VMEM on all gens)


# ----------------------------- Pallas kernel -------------------------------
def net_fwd_kernel(x_ref, w1_ref, w2_ref, b_ref, out_ref):
    """Fused two-layer forward.

    x_ref   : (block_b, s_dim)        f32
    w1_ref  : (s_dim, 2*hidden)       bf16 or f32   [wp1 | wv1]
    w2_ref  : (2*hidden, out_pad)     bf16 or f32   block-diag [wp2; wv2], 0-padded
    b_ref   : (1, 2*hidden + out_pad) f32           [b1 | b2_padded]
    out_ref : (block_b, out_pad)      f32 or bf16   lane-dense output slab
    """
    h2 = w1_ref.shape[1]                                   # fused hidden width

    x = x_ref[...].astype(w1_ref.dtype)                    # cheap VPU cast
    # ---- layer 1 (both branches at once), f32 accumulate on the MXU ----
    h = jnp.dot(x, w1_ref[...], preferred_element_type=jnp.float32)
    h = jnp.maximum(h + b_ref[:, :h2], 0.0)                # f32 bias + ReLU
    # ---- layer 2 (block-diagonal => policy & value in one matmul) ----
    out = jnp.dot(h.astype(w2_ref.dtype), w2_ref[...],
                  preferred_element_type=jnp.float32)
    out_ref[...] = (out + b_ref[:, h2:]).astype(out_ref.dtype)   # one dense vst


# ------------------------------ wrapper ------------------------------------
def _choose_batch_tile(B):
    """Pick (block_b, b_pad).  B<=128: single step. B>128: even #steps, tile<=512."""
    if B <= 128:
        block_b = _round_up(B, 8)
        return block_b, block_b
    b8 = _round_up(B, 8)
    n_steps = max(2, 2 * pl.cdiv(b8, 2 * _MAX_BLOCK_B))    # even, >= 2 (v7x megacore)
    block_b = _round_up(pl.cdiv(b8, n_steps), 8)           # <= 512, sublane-aligned
    return block_b, block_b * n_steps


def _build_call(block_b, b_pad, s_dim, h2, out_pad, out_dtype, cost,
                single_buffer_weights):
    if single_buffer_weights:
        # Grid-constant operands: one buffer is enough (index_map is constant).
        resident = dict(pipeline_mode=pl.Buffered(buffer_count=1))
    else:
        resident = {}
    in_specs = [
        pl.BlockSpec((block_b, s_dim), lambda i: (i, 0)),               # x
        pl.BlockSpec((s_dim, h2), lambda i: (0, 0), **resident),        # W1p
        pl.BlockSpec((h2, out_pad), lambda i: (0, 0), **resident),      # W2p
        pl.BlockSpec((1, h2 + out_pad), lambda i: (0, 0), **resident),  # biases
    ]
    return pl.pallas_call(
        net_fwd_kernel,
        out_shape=jax.ShapeDtypeStruct((b_pad, out_pad), out_dtype),
        grid=(b_pad // block_b,),
        in_specs=in_specs,
        out_specs=pl.BlockSpec((block_b, out_pad), lambda i: (i, 0)),
        compiler_params=pltpu.CompilerParams(
            dimension_semantics=("parallel",)),
        cost_estimate=cost,
    )


def net_forward(x, packed, a_dim, out_dtype=jnp.float32):
    """Pallas implementation of Net.forward: returns (logits, value)."""
    w1, w2, b = packed
    B, s_dim = x.shape
    h2 = w1.shape[1]            # 2 * hidden
    out_pad = w2.shape[1]       # padded output lanes (multiple of 128)

    block_b, b_pad = _choose_batch_tile(B)
    if b_pad != B:
        x = jnp.pad(x, ((0, b_pad - B), (0, 0)))

    flops = 2 * b_pad * (s_dim * h2 + h2 * out_pad)
    bytes_accessed = (x.size * x.dtype.itemsize
                      + w1.size * w1.dtype.itemsize
                      + w2.size * w2.dtype.itemsize
                      + b.size * b.dtype.itemsize
                      + b_pad * out_pad * jnp.dtype(out_dtype).itemsize)
    cost = pl.CostEstimate(flops=flops, transcendentals=0,
                           bytes_accessed=bytes_accessed)

    try:
        out = _build_call(block_b, b_pad, s_dim, h2, out_pad, out_dtype, cost,
                          single_buffer_weights=True)(x, w1, w2, b)
    except Exception:
        # Fallback: some builds may not accept Buffered(1); default buffering
        # is correct, just slightly more VMEM / DMA scheduling.
        out = _build_call(block_b, b_pad, s_dim, h2, out_pad, out_dtype, cost,
                          single_buffer_weights=False)(x, w1, w2, b)

    out = out[:B]
    logits = out[:, :a_dim]
    value = out[:, a_dim:a_dim + 1]
    return logits, value


# --------------------------- parameter handling ------------------------------
def init_params(key, s_dim, a_dim, hidden=256):
    """Matches set_init(): weights ~ N(0, 0.1), biases = 0.

    Weights generated in PyTorch (out, in) layout then transposed to (in, out)
    so semantics match nn.Linear exactly.
    """
    ks = jax.random.split(key, 4)
    std = 0.1

    def linear(k, in_f, out_f):
        w_pt = std * jax.random.normal(k, (out_f, in_f), dtype=jnp.float32)
        b = jnp.zeros((1, out_f), dtype=jnp.float32)
        return w_pt.T, b                                      # (in,out), (1,out)

    wp1, bp1 = linear(ks[0], s_dim, hidden)     # policy1
    wp2, bp2 = linear(ks[1], hidden, a_dim)     # policy2
    wv1, bv1 = linear(ks[2], s_dim, hidden)     # value1
    wv2, bv2 = linear(ks[3], hidden, 1)         # value2
    return (wp1, bp1, wp2, bp2, wv1, bv1, wv2, bv2)


def pack_params(params, a_dim, compute_dtype=jnp.bfloat16):
    """One-time packing: fuse branches, block-diagonalize layer 2, pad lanes."""
    wp1, bp1, wp2, bp2, wv1, bv1, wv2, bv2 = params
    s_dim, hidden = wp1.shape
    h2 = 2 * hidden
    out_pad = _round_up(a_dim + 1, 128)

    # layer 1: concat policy | value
    w1 = jnp.concatenate([wp1, wv1], axis=1).astype(compute_dtype)   # (s_dim, 2H)

    # layer 2: block-diagonal, zero-padded to a lane-dense 128-wide output
    w2 = jnp.zeros((h2, out_pad), jnp.float32)
    w2 = w2.at[:hidden, :a_dim].set(wp2)
    w2 = w2.at[hidden:, a_dim:a_dim + 1].set(wv2)
    w2 = w2.astype(compute_dtype)

    # biases packed into a single f32 row: [b1 (2H) | b2 (out_pad)]
    b = jnp.zeros((1, h2 + out_pad), jnp.float32)
    b = b.at[:, :hidden].set(bp1)
    b = b.at[:, hidden:h2].set(bv1)
    b = b.at[:, h2:h2 + a_dim].set(bp2)
    b = b.at[:, h2 + a_dim:h2 + a_dim + 1].set(bv2)
    return (w1, w2, b)


# ------------------------ pure-JAX reference --------------------------------
def net_forward_ref(x, params):
    wp1, bp1, wp2, bp2, wv1, bv1, wv2, bv2 = params
    h_p = jnp.maximum(x @ wp1 + bp1, 0.0)
    logits = h_p @ wp2 + bp2
    h_v = jnp.maximum(x @ wv1 + bv1, 0.0)
    value = h_v @ wv2 + bv2
    return logits, value


# ------------------------------- main ---------------------------------------
if __name__ == "__main__":
    key = jax.random.PRNGKey(0)
    k_x, k_p, k_big = jax.random.split(key, 3)

    B, S_DIM, A_DIM = 16, 16, 4          # batch, state dim, action dim
    x = jax.random.normal(k_x, (B, S_DIM), dtype=jnp.float32)
    params = init_params(k_p, S_DIM, A_DIM)
    logits_ref, value_ref = net_forward_ref(x, params)

    # --- f32 operand path: must match the PyTorch-semantics reference tightly
    packed_f32 = pack_params(params, A_DIM, compute_dtype=jnp.float32)
    logits_f32, value_f32 = net_forward(x, packed_f32, A_DIM)
    jax.block_until_ready((logits_f32, value_f32))
    assert logits_f32.shape == (B, A_DIM) and value_f32.shape == (B, 1)
    assert jnp.allclose(logits_f32, logits_ref, atol=1e-4, rtol=1e-4)
    assert jnp.allclose(value_f32, value_ref, atol=1e-4, rtol=1e-4)

    # --- bf16 matmul operands + bf16 output slab (fast MXU + halved writeback)
    packed_bf16 = pack_params(params, A_DIM, compute_dtype=jnp.bfloat16)
    logits_bf, value_bf = net_forward(x, packed_bf16, A_DIM,
                                      out_dtype=jnp.bfloat16)
    jax.block_until_ready((logits_bf, value_bf))
    assert logits_bf.shape == (B, A_DIM) and value_bf.shape == (B, 1)
    assert jnp.allclose(logits_bf.astype(jnp.float32), logits_ref,
                        atol=5e-2, rtol=5e-2)
    assert jnp.allclose(value_bf.astype(jnp.float32), value_ref,
                        atol=5e-2, rtol=5e-2)

    # --- large-batch path: big tile, even #grid steps (both TCs on v7x)
    BIG_B = 600
    x_big = jax.random.normal(k_big, (BIG_B, S_DIM), dtype=jnp.float32)
    logits_big, value_big = net_forward(x_big, packed_f32, A_DIM)
    jax.block_until_ready((logits_big, value_big))
    logits_big_ref, value_big_ref = net_forward_ref(x_big, params)
    assert logits_big.shape == (BIG_B, A_DIM) and value_big.shape == (BIG_B, 1)
    assert jnp.allclose(logits_big, logits_big_ref, atol=1e-4, rtol=1e-4)
    assert jnp.allclose(value_big, value_big_ref, atol=1e-4, rtol=1e-4)

    print("KERNEL_OK")
</pallas_src>

<mosaic_0001>
module attributes {stable_mosaic.version = 11 : i64} {
  func.func @net_fwd_kernel(%arg0: i32, %arg1: memref<16x16xf32, #tpu.memory_space<vmem>>, %arg2: memref<16x512xf32, #tpu.memory_space<vmem>>, %arg3: memref<512x128xf32, #tpu.memory_space<vmem>>, %arg4: memref<1x640xf32, #tpu.memory_space<vmem>>, %arg5: memref<16x128xf32, #tpu.memory_space<vmem>>) attributes {dimension_semantics = [#tpu.dimension_semantics<parallel>], iteration_bounds = array<i64: 1>, scalar_prefetch = 0 : i64, scratch_operands = 0 : i64, tpu.core_type = #tpu.core_type<tc>, window_params = [{transform_indices = @transform_0, window_bounds = array<i64: 16, 16>}, {pipeline_mode = #tpu.pipeline_mode<synchronous>, transform_indices = @transform_1, window_bounds = array<i64: 16, 512>}, {pipeline_mode = #tpu.pipeline_mode<synchronous>, transform_indices = @transform_2, window_bounds = array<i64: 512, 128>}, {pipeline_mode = #tpu.pipeline_mode<synchronous>, transform_indices = @transform_3, window_bounds = array<i64: 1, 640>}, {transform_indices = @transform_4, window_bounds = array<i64: 16, 128>}]} {
    %c0 = arith.constant 0 : index
    %c0_0 = arith.constant 0 : index
    %0 = vector.load %arg1[%c0, %c0_0] : memref<16x16xf32, #tpu.memory_space<vmem>>, vector<16x16xf32>
    %c0_1 = arith.constant 0 : index
    %c0_2 = arith.constant 0 : index
    %1 = vector.load %arg2[%c0_1, %c0_2] : memref<16x512xf32, #tpu.memory_space<vmem>>, vector<16x512xf32>
    %cst = arith.constant dense<0.000000e+00> : vector<16x512xf32>
    %2 = tpu.matmul %0, %1, %cst {dimension_numbers = #tpu.dot_dimension_numbers<[1], [0], [0], [1], [0, 0, 1, 1], [], []>} : vector<16x16xf32>, vector<16x512xf32>, vector<16x512xf32> -> vector<16x512xf32>
    %c0_3 = arith.constant 0 : index
    %c0_4 = arith.constant 0 : index
    %3 = vector.load %arg4[%c0_3, %c0_4] : memref<1x640xf32, #tpu.memory_space<vmem>>, vector<1x512xf32>
    %4 = vector.broadcast %3 : vector<1x512xf32> to vector<16x512xf32>
    %5 = arith.addf %2, %4 : vector<16x512xf32>
    %cst_5 = arith.constant 0.000000e+00 : f32
    %6 = vector.broadcast %cst_5 : f32 to vector<16x512xf32>
    %7 = arith.maximumf %5, %6 : vector<16x512xf32>
    %c0_6 = arith.constant 0 : index
    %c0_7 = arith.constant 0 : index
    %8 = vector.load %arg3[%c0_6, %c0_7] : memref<512x128xf32, #tpu.memory_space<vmem>>, vector<512x128xf32>
    %cst_8 = arith.constant dense<0.000000e+00> : vector<16x128xf32>
    %9 = tpu.matmul %7, %8, %cst_8 {dimension_numbers = #tpu.dot_dimension_numbers<[1], [0], [0], [1], [0, 0, 1, 1], [], []>} : vector<16x512xf32>, vector<512x128xf32>, vector<16x128xf32> -> vector<16x128xf32>
    %c0_9 = arith.constant 0 : index
    %c512 = arith.constant 512 : index
    %10 = vector.load %arg4[%c0_9, %c512] : memref<1x640xf32, #tpu.memory_space<vmem>>, vector<1x128xf32>
    %11 = vector.broadcast %10 : vector<1x128xf32> to vector<16x128xf32>
    %12 = arith.addf %9, %11 : vector<16x128xf32>
    %c0_10 = arith.constant 0 : index
    %c0_11 = arith.constant 0 : index
    %13 = vector.load %arg5[%c0_10, %c0_11] : memref<16x128xf32, #tpu.memory_space<vmem>>, vector<16x128xf32>
    tpu.vector_store %arg5[%c0_10, %c0_11], %12 {strides = array<i32>} : memref<16x128xf32, #tpu.memory_space<vmem>>, vector<16x128xf32>,
    return
  }
  func.func @transform_0(%arg0: i32) -> (i32, i32) {
    %c0_i32 = arith.constant 0 : i32
    %c0_i32_0 = arith.constant 0 : i32
    return %arg0, %c0_i32 : i32, i32
  }
  func.func @transform_1(%arg0: i32) -> (i32, i32) {
    %c0_i32 = arith.constant 0 : i32
    %c0_i32_0 = arith.constant 0 : i32
    %c0_i32_1 = arith.constant 0 : i32
    return %c0_i32, %c0_i32_0 : i32, i32
  }
  func.func @transform_2(%arg0: i32) -> (i32, i32) {
    %c0_i32 = arith.constant 0 : i32
    %c0_i32_0 = arith.constant 0 : i32
    %c0_i32_1 = arith.constant 0 : i32
    return %c0_i32, %c0_i32_0 : i32, i32
  }
  func.func @transform_3(%arg0: i32) -> (i32, i32) {
    %c0_i32 = arith.constant 0 : i32
    %c0_i32_0 = arith.constant 0 : i32
    %c0_i32_1 = arith.constant 0 : i32
    return %c0_i32, %c0_i32_0 : i32, i32
  }
  func.func @transform_4(%arg0: i32) -> (i32, i32) {
    %c0_i32 = arith.constant 0 : i32
    %c0_i32_0 = arith.constant 0 : i32
    return %arg0, %c0_i32 : i32, i32
  }
}

module attributes {stable_mosaic.version = 11 : i64} {
  func.func @net_fwd_kernel(%arg0: i32, %arg1: memref<16x16xf32, #tpu.memory_space<vmem>>, %arg2: memref<16x512xf32, #tpu.memory_space<vmem>>, %arg3: memref<512x128xf32, #tpu.memory_space<vmem>>, %arg4: memref<1x640xf32, #tpu.memory_space<vmem>>, %arg5: memref<16x128xf32, #tpu.memory_space<vmem>>) attributes {dimension_semantics = [#tpu.dimension_semantics<parallel>], iteration_bounds = array<i64: 1>, scalar_prefetch = 0 : i64, scratch_operands = 0 : i64, tpu.core_type = #tpu.core_type<tc>, window_params = [{transform_indices = @transform_0, window_bounds = array<i64: 16, 16>}, {pipeline_mode = #tpu.pipeline_mode<synchronous>, transform_indices = @transform_1, window_bounds = array<i64: 16, 512>}, {pipeline_mode = #tpu.pipeline_mode<synchronous>, transform_indices = @transform_2, window_bounds = array<i64: 512, 128>}, {pipeline_mode = #tpu.pipeline_mode<synchronous>, transform_indices = @transform_3, window_bounds = array<i64: 1, 640>}, {transform_indices = @transform_4, window_bounds = array<i64: 16, 128>}]} {
    %c0 = arith.constant 0 : index
    %c0_0 = arith.constant 0 : index
    %0 = vector.load %arg1[%c0, %c0_0] : memref<16x16xf32, #tpu.memory_space<vmem>>, vector<16x16xf32>
    %c0_1 = arith.constant 0 : index
    %c0_2 = arith.constant 0 : index
    %1 = vector.load %arg2[%c0_1, %c0_2] : memref<16x512xf32, #tpu.memory_space<vmem>>, vector<16x512xf32>
    %cst = arith.constant dense<0.000000e+00> : vector<16x512xf32>
    %2 = tpu.matmul %0, %1, %cst {dimension_numbers = #tpu.dot_dimension_numbers<[1], [0], [0], [1], [0, 0, 1, 1], [], []>} : vector<16x16xf32>, vector<16x512xf32>, vector<16x512xf32> -> vector<16x512xf32>
    %c0_3 = arith.constant 0 : index
    %c0_4 = arith.constant 0 : index
    %3 = vector.load %arg4[%c0_3, %c0_4] : memref<1x640xf32, #tpu.memory_space<vmem>>, vector<1x512xf32>
    %4 = vector.broadcast %3 : vector<1x512xf32> to vector<16x512xf32>
    %5 = arith.addf %2, %4 : vector<16x512xf32>
    %cst_5 = arith.constant 0.000000e+00 : f32
    %6 = vector.broadcast %cst_5 : f32 to vector<16x512xf32>
    %7 = arith.maximumf %5, %6 : vector<16x512xf32>
    %c0_6 = arith.constant 0 : index
    %c0_7 = arith.constant 0 : index
    %8 = vector.load %arg3[%c0_6, %c0_7] : memref<512x128xf32, #tpu.memory_space<vmem>>, vector<512x128xf32>
    %cst_8 = arith.constant dense<0.000000e+00> : vector<16x128xf32>
    %9 = tpu.matmul %7, %8, %cst_8 {dimension_numbers = #tpu.dot_dimension_numbers<[1], [0], [0], [1], [0, 0, 1, 1], [], []>} : vector<16x512xf32>, vector<512x128xf32>, vector<16x128xf32> -> vector<16x128xf32>
    %c0_9 = arith.constant 0 : index
    %c512 = arith.constant 512 : index
    %10 = vector.load %arg4[%c0_9, %c512] : memref<1x640xf32, #tpu.memory_space<vmem>>, vector<1x128xf32>
    %11 = vector.broadcast %10 : vector<1x128xf32> to vector<16x128xf32>
    %12 = arith.addf %9, %11 : vector<16x128xf32>
    %c0_10 = arith.constant 0 : index
    %c0_11 = arith.constant 0 : index
    %13 = vector.load %arg5[%c0_10, %c0_11] : memref<16x128xf32, #tpu.memory_space<vmem>>, vector<16x128xf32>
    tpu.vector_store %arg5[%c0_10, %c0_11], %12 {strides = array<i32>} : memref<16x128xf32, #tpu.memory_space<vmem>>, vector<16x128xf32>,
    return
  }
  func.func @transform_0(%arg0: i32) -> (i32, i32) {
    %c0_i32 = arith.constant 0 : i32
    %c0_i32_0 = arith.constant 0 : i32
    return %arg0, %c0_i32 : i32, i32
  }
  func.func @transform_1(%arg0: i32) -> (i32, i32) {
    %c0_i32 = arith.constant 0 : i32
    %c0_i32_0 = arith.constant 0 : i32
    %c0_i32_1 = arith.constant 0 : i32
    return %c0_i32, %c0_i32_0 : i32, i32
  }
  func.func @transform_2(%arg0: i32) -> (i32, i32) {
    %c0_i32 = arith.constant 0 : i32
    %c0_i32_0 = arith.constant 0 : i32
    %c0_i32_1 = arith.constant 0 : i32
    return %c0_i32, %c0_i32_0 : i32, i32
  }
  func.func @transform_3(%arg0: i32) -> (i32, i32) {
    %c0_i32 = arith.constant 0 : i32
    %c0_i32_0 = arith.constant 0 : i32
    %c0_i32_1 = arith.constant 0 : i32
    return %c0_i32, %c0_i32_0 : i32, i32
  }
  func.func @transform_4(%arg0: i32) -> (i32, i32) {
    %c0_i32 = arith.constant 0 : i32
    %c0_i32_0 = arith.constant 0 : i32
    return %arg0, %c0_i32 : i32, i32
  }
}

</mosaic_0001>

<bundles_post_ra>
// kernel: tpu_custom_call.1
= control target key start
LH: loop header
LB: loop body
LE: loop exit
PB: predicated region body
PF: predicated region fallthrough
CT: control target
= control target key end

     0   :  { %9 = vsyncpa [#allocation3], 0  ;;  %s601_s0 = inlined_call_operand.hbm [shape: f32[16,16], index: 0, kind: input, shape index: {}]   ;;  %s602_s1 = inlined_call_operand.hbm [shape: f32[16,512], index: 1, kind: input, shape index: {}]   ;;  %s603_s2 = inlined_call_operand.hbm [shape: f32[512,128], index: 2, kind: input, shape index: {}]   ;;  %s604_s3 = inlined_call_operand.hbm [shape: f32[1,640], index: 3, kind: input, shape index: {}]   ;;  %s605_s4 = inlined_call_operand.hbm [shape: f32[16,128], index: 4, kind: output, shape index: {}]  }
   0x1   :  { %10 = vsyncpa [#allocation6], 0 }
   0x2   :  { %11 = vsyncpa [#allocation9], 0  ;;  %s30_s17 = sshll.u32 %s602_s1, 4  ;;  %s31_s17 = int_to_ptr.hbm [resolvable:$true] %s30_s17 }
   0x3   :  { %12 = vsyncpa [#allocation4], 0  ;;  %s535_s18 = smov [#allocation5]   ;;  %s17_s22 = sshll.u32 %s601_s0, 4  ;;  %s18_s22 = int_to_ptr.hbm [resolvable:$true] %s17_s22 }
   0x4   :  { %s32_s19 = sshll.u32 %s535_s18, 4  ;;  %s536_s23 = smov 512   ;;  %s33_s19 = int_to_ptr.vmem [resolvable:$true] %s32_s19 }
   0x5   :  { %s537_s24 = smov 32   ;;  %s538_s25 = smov [#allocation2]  }
   0x6   :  { %38 = dma.hbm_to_vmem [thread:$0]  %s31_s17, 1024, %s33_s19, [#allocation6], %s536_s23, %s536_s23, %s537_s24  }
   0x7   :  { %s19_s26 = sshll.u32 %s538_s25, 4  ;;  %s539_s27 = smov 128   ;;  %s20_s26 = int_to_ptr.vmem [resolvable:$true] %s19_s26 }
   0x8   :  { %s540_s28 = smov 8   ;;  %s43_s30 = sshll.u32 %s603_s2, 4  ;;  %s44_s30 = int_to_ptr.hbm [resolvable:$true] %s43_s30 }
   0x9   :  { %25 = dma.hbm_to_vmem [thread:$0]  %s18_s22, 256, %s20_s26, [#allocation3], %s539_s27, %s539_s27, %s540_s28  }
   0xa   :  { %s541_s5 = smov [#allocation7]   ;;  %s57_s8 = sshll.u32 %s604_s3, 4  ;;  %s58_s8 = int_to_ptr.hbm [resolvable:$true] %s57_s8 }
   0xb   :  { %s45_s0 = sshll.u32 %s541_s5, 4  ;;  %s542_s9 = smov [#allocation8]   ;;  %s46_s0 = int_to_ptr.vmem [resolvable:$true] %s45_s0 }
   0xc   :  { %51 = dma.hbm_to_vmem [thread:$0]  %s44_s30, 8192, %s46_s0, [#allocation6], %s539_s27, %s539_s27, %s540_s28  }
   0xd   :  { %s59_s10 = sshll.u32 %s542_s9, 4  ;;  %s60_s10 = int_to_ptr.vmem [resolvable:$true] %s59_s10 }
   0xe   :  { %62 = dma.hbm_to_vmem [thread:$0]  %s58_s8, 80, %s60_s10, [#allocation9]  }
   0xf   :  { %527 = dma.done.wait [#allocation3], 256  }
  0x10   :  { %528 = vsyncadd [#allocation3], 4294967040 }
  0x11   :  { %529 = dma.done.wait [#allocation6], 9216  }
  0x12   :  { %530 = vsyncadd [#allocation6], 4294958080 }
  0x13   :  { %531 = dma.done.wait [#allocation9], 80  }
  0x14   :  { %532 = vsyncadd [#allocation9], 4294967216  ;;  %v87_v0 = vld [vmem:[#allocation5 + $0x30] sm:$0xff]  ;;  %v88_v2 = vld [vmem:[#allocation5 + $0x38] sm:$0xff]  ;;  %vm99_vm0 = vcmask 130048   ;;  %s543_s2 = smov [#allocation10]  }
  0x15   :  { %v83_v1 = vld [vmem:[#allocation5 + $0x10] sm:$0xff]  ;;  %166 = vmatpush.msra.mxu2 %v87_v0  ;;  %189 = vmatpush.msra.mxu3 %v88_v2  ;;  %v84_v4 = vld [vmem:[#allocation5 + $0x18] sm:$0xff]  ;;  %v85_v5 = vld [vmem:[#allocation5 + $0x20] sm:$0xff]  ;;  %s372_s3 = sshll.u32 %s543_s2, 4  ;;  %s374_s13 = sshll.u32 %s605_s4, 4  ;;  %s373_s3 = int_to_ptr.vmem [resolvable:$true] %s372_s3  ;;  %s375_s13 = int_to_ptr.hbm [resolvable:$true] %s374_s13 }
  0x16   :  { %v79_v3 = vld [vmem:[#allocation2] sm:$0xff]  ;;  %120 = vmatpush.msra.mxu0 %v85_v5  ;;  %v81_v6 = vld [vmem:[#allocation5] sm:$0xff]  ;;  %v86_v7 = vld [vmem:[#allocation5 + $0x28] sm:$0xff] }
  0x17   :  { %167 = vmatpush.msra.mxu2 %v83_v1  ;;  %190 = vmatpush.msra.mxu3 %v84_v4  ;;  %v253_v8 = vld [vmem:[#allocation7 + $0x178] sm:$0xff]  ;;  %v82_v9 = vld [vmem:[#allocation5 + $0x8] sm:$0xff]  ;;  %v252_v11 = vld [vmem:[#allocation7 + $0x170] sm:$0xff] }
  0x18   :  { %393 = vmatmul.msk.f32.vlgmr.msra.gmra.mxu2 %vm99_vm0, %v79_v3  ;;  %395 = vmatmul.msk.f32.vlgmr.msra.gmra.mxu3 %vm99_vm0, %v79_v3  ;;  %v221_v10 = vld [vmem:[#allocation7 + $0x78] sm:$0xff]  ;;  %v220_v13 = vld [vmem:[#allocation7 + $0x70] sm:$0xff]  ;;  %v251_v15 = vld [vmem:[#allocation7 + $0x168] sm:$0xff] }
  0x19   :  { %121 = vmatpush.msra.mxu0 %v81_v6  ;;  %143 = vmatpush.msra.mxu1 %v86_v7  ;;  %v269_v12 = vld [vmem:[#allocation7 + $0x1f8] sm:$0xff]  ;;  %v268_v16 = vld [vmem:[#allocation7 + $0x1f0] sm:$0xff]  ;;  %v219_v17 = vld [vmem:[#allocation7 + $0x68] sm:$0xff] }
  0x1a   :  { %389 = vmatmul.msk.f32.vlgmr.msra.gmra.mxu0 %vm99_vm0, %v79_v3  ;;  %320 = vmatpush.msrb.mxu2 %v253_v8  ;;  %v237_v14 = vld [vmem:[#allocation7 + $0xf8] sm:$0xff]  ;;  %v236_v19 = vld [vmem:[#allocation7 + $0xf0] sm:$0xff]  ;;  %v250_v20 = vld [vmem:[#allocation7 + $0x160] sm:$0xff] }
  0x1b   :  { %144 = vmatpush.msra.mxu1 %v82_v9  ;;  %274 = vmatpush.msrb.mxu0 %v221_v10  ;;  %v80_v18 = vld [vmem:[#allocation2 + $0x8] sm:$0xff]  ;;  %v267_v21 = vld [vmem:[#allocation7 + $0x1e8] sm:$0xff]  ;;  %v218_v22 = vld [vmem:[#allocation7 + $0x60] sm:$0xff] }
  0x1c   :  { %391 = vmatmul.msk.f32.vlgmr.msra.gmra.mxu1 %vm99_vm0, %v79_v3  ;;  %321 = vmatpush.msrb.mxu2 %v252_v11  ;;  %v235_v23 = vld [vmem:[#allocation7 + $0xe8] sm:$0xff]  ;;  %v249_v24 = vld [vmem:[#allocation7 + $0x158] sm:$0xff]  ;;  %v266_v25 = vld [vmem:[#allocation7 + $0x1e0] sm:$0xff] }
  0x1d   :  { %343 = vmatpush.msrb.mxu3 %v269_v12  ;;  %275 = vmatpush.msrb.mxu0 %v220_v13  ;;  %v217_v26 = vld [vmem:[#allocation7 + $0x58] sm:$0xff]  ;;  %v234_v27 = vld [vmem:[#allocation7 + $0xe0] sm:$0xff]  ;;  %v248_v28 = vld [vmem:[#allocation7 + $0x150] sm:$0xff] }
  0x1e   :  { %297 = vmatpush.msrb.mxu1 %v237_v14  ;;  %322 = vmatpush.msrb.mxu2 %v251_v15  ;;  %v265_v29 = vld [vmem:[#allocation7 + $0x1d8] sm:$0xff]  ;;  %v216_v30 = vld [vmem:[#allocation7 + $0x50] sm:$0xff]  ;;  %v247_v32 = vld [vmem:[#allocation7 + $0x148] sm:$0xff] }
  0x1f   :  { %344 = vmatpush.msrb.mxu3 %v268_v16  ;;  %276 = vmatpush.msrb.mxu0 %v219_v17  ;;  %v233_v31 = vld [vmem:[#allocation7 + $0xd8] sm:$0xff]  ;;  %v264_v33 = vld [vmem:[#allocation7 + $0x1d0] sm:$0xff]  ;;  %v215_v34 = vld [vmem:[#allocation7 + $0x48] sm:$0xff] }
  0x20   :  { %394 = vmatmul.msk.f32.gmra.mxu2 %vm99_vm0, %v80_v18  ;;  %396 = vmatmul.msk.f32.gmra.mxu3 %vm99_vm0, %v80_v18  ;;  %v232_v35 = vld [vmem:[#allocation7 + $0xd0] sm:$0xff]  ;;  %v246_v36 = vld [vmem:[#allocation7 + $0x140] sm:$0xff]  ;;  %v263_v37 = vld [vmem:[#allocation7 + $0x1c8] sm:$0xff] }
  0x21   :  { %298 = vmatpush.msrb.mxu1 %v236_v19  ;;  %323 = vmatpush.msrb.mxu2 %v250_v20  ;;  %v214_v38 = vld [vmem:[#allocation7 + $0x40] sm:$0xff]  ;;  %v231_v39 = vld [vmem:[#allocation7 + $0xc8] sm:$0xff]  ;;  %v245_v40 = vld [vmem:[#allocation7 + $0x138] sm:$0xff] }
  0x22   :  { %390 = vmatmul.msk.f32.gmra.mxu0 %vm99_vm0, %v80_v18  ;;  %345 = vmatpush.msrb.mxu3 %v267_v21  ;;  %v262_v41 = vld [vmem:[#allocation7 + $0x1c0] sm:$0xff]  ;;  %v213_v42 = vld [vmem:[#allocation7 + $0x38] sm:$0xff]  ;;  %v244_v44 = vld [vmem:[#allocation7 + $0x130] sm:$0xff] }
  0x23   :  { %277 = vmatpush.msrb.mxu0 %v218_v22  ;;  %299 = vmatpush.msrb.mxu1 %v235_v23  ;;  %v230_v43 = vld [vmem:[#allocation7 + $0xc0] sm:$0xff]  ;;  %v261_v45 = vld [vmem:[#allocation7 + $0x1b8] sm:$0xff]  ;;  %v212_v46 = vld [vmem:[#allocation7 + $0x30] sm:$0xff] }
  0x24   :  { %392 = vmatmul.msk.f32.gmra.mxu1 %vm99_vm0, %v80_v18  ;;  %324 = vmatpush.msrb.mxu2 %v249_v24  ;;  %v229_v47 = vld [vmem:[#allocation7 + $0xb8] sm:$0xff]  ;;  %v243_v48 = vld [vmem:[#allocation7 + $0x128] sm:$0xff]  ;;  %v260_v49 = vld [vmem:[#allocation7 + $0x1b0] sm:$0xff] }
  0x25   :  { %346 = vmatpush.msrb.mxu3 %v266_v25  ;;  %278 = vmatpush.msrb.mxu0 %v217_v26  ;;  %v211_v50 = vld [vmem:[#allocation7 + $0x28] sm:$0xff]  ;;  %v228_v51 = vld [vmem:[#allocation7 + $0xb0] sm:$0xff]  ;;  %v242_v52 = vld [vmem:[#allocation7 + $0x120] sm:$0xff] }
  0x26   :  { %300 = vmatpush.msrb.mxu1 %v234_v27  ;;  %325 = vmatpush.msrb.mxu2 %v248_v28  ;;  %v259_v53 = vld [vmem:[#allocation7 + $0x1a8] sm:$0xff]  ;;  %v210_v54 = vld [vmem:[#allocation7 + $0x20] sm:$0xff]  ;;  %v241_v56 = vld [vmem:[#allocation7 + $0x118] sm:$0xff] }
  0x27   :  { %347 = vmatpush.msrb.mxu3 %v265_v29  ;;  %279 = vmatpush.msrb.mxu0 %v216_v30  ;;  %v227_v55 = vld [vmem:[#allocation7 + $0xa8] sm:$0xff]  ;;  %v258_v57 = vld [vmem:[#allocation7 + $0x1a0] sm:$0xff]  ;;  %v209_v58 = vld [vmem:[#allocation7 + $0x18] sm:$0xff] }
  0x28   :  { %301 = vmatpush.msrb.mxu1 %v233_v31  ;;  %326 = vmatpush.msrb.mxu2 %v247_v32  ;;  %v226_v59 = vld [vmem:[#allocation7 + $0xa0] sm:$0xff]  ;;  %v240_v60 = vld [vmem:[#allocation7 + $0x110] sm:$0xff]  ;;  %v257_v61 = vld [vmem:[#allocation7 + $0x198] sm:$0xff] }
  0x29   :  { %348 = vmatpush.msrb.mxu3 %v264_v33  ;;  %280 = vmatpush.msrb.mxu0 %v215_v34  ;;  %v208_v62 = vld [vmem:[#allocation7 + $0x10] sm:$0xff]  ;;  %v225_v63 = vld [vmem:[#allocation7 + $0x98] sm:$0xff]  ;;  %v239_v0 = vld [vmem:[#allocation7 + $0x108] sm:$0xff] }
  0x2a   :  { %302 = vmatpush.msrb.mxu1 %v232_v35  ;;  %327 = vmatpush.msrb.mxu2 %v246_v36  ;;  %v256_v1 = vld [vmem:[#allocation7 + $0x190] sm:$0xff]  ;;  %v207_v2 = vld [vmem:[#allocation7 + $0x8] sm:$0xff]  ;;  %v238_v4 = vld [vmem:[#allocation7 + $0x100] sm:$0xff] }
  0x2b   :  { %349 = vmatpush.msrb.mxu3 %v263_v37  ;;  %281 = vmatpush.msrb.mxu0 %v214_v38  ;;  %v224_v3 = vld [vmem:[#allocation7 + $0x90] sm:$0xff]  ;;  %v255_v5 = vld [vmem:[#allocation7 + $0x188] sm:$0xff]  ;;  %v206_v6 = vld [vmem:[#allocation7] sm:$0xff] }
  0x2c   :  { %303 = vmatpush.msrb.mxu1 %v231_v39  ;;  %328 = vmatpush.msrb.mxu2 %v245_v40  ;;  %v223_v7 = vld [vmem:[#allocation7 + $0x88] sm:$0xff]  ;;  %v254_v8 = vld [vmem:[#allocation7 + $0x180] sm:$0xff] }
  0x2d   :  { %350 = vmatpush.msrb.mxu3 %v262_v41  ;;  %282 = vmatpush.msrb.mxu0 %v213_v42  ;;  %v222_v9 = vld [vmem:[#allocation7 + $0x80] sm:$0xff] }
  0x2e   :  { %304 = vmatpush.msrb.mxu1 %v230_v43  ;;  %329 = vmatpush.msrb.mxu2 %v244_v44  ;;  %v89_v10 = vld [vmem:[#allocation8] sm:$0xf]  ;;  %v406_v39 = vld [vmem:[#allocation8 + $0x4] ss:$0 sm:$0xff] }
  0x2f   :  { %351 = vmatpush.msrb.mxu3 %v261_v45  ;;  %283 = vmatpush.msrb.mxu0 %v212_v46  ;;  %v91_v11 = vperm.slane %v89_v10, 0  ;;  %v92_v12 = vperm.slane %v89_v10, 1  ;;  %v93_v14 = vperm.slane %v89_v10, 2  ;;  %v94_v16 = vperm.slane %v89_v10, 3 }
  0x30   :  { %305 = vmatpush.msrb.mxu1 %v229_v47  ;;  %330 = vmatpush.msrb.mxu2 %v243_v48 }
  0x31   :  { %352 = vmatpush.msrb.mxu3 %v260_v49  ;;  %284 = vmatpush.msrb.mxu0 %v211_v50 }
  0x32   :  { %306 = vmatpush.msrb.mxu1 %v228_v51  ;;  %331 = vmatpush.msrb.mxu2 %v242_v52 }
  0x33   :  { %353 = vmatpush.msrb.mxu3 %v259_v53  ;;  %285 = vmatpush.msrb.mxu0 %v210_v54 }
  0x34   :  { %307 = vmatpush.msrb.mxu1 %v227_v55  ;;  %332 = vmatpush.msrb.mxu2 %v241_v56 }
  0x35   :  { %354 = vmatpush.msrb.mxu3 %v258_v57  ;;  %286 = vmatpush.msrb.mxu0 %v209_v58 }
  0x36   :  { %308 = vmatpush.msrb.mxu1 %v226_v59  ;;  %333 = vmatpush.msrb.mxu2 %v240_v60 }
  0x37   :  { %355 = vmatpush.msrb.mxu3 %v257_v61  ;;  %287 = vmatpush.msrb.mxu0 %v208_v62 }
  0x38   :  { %309 = vmatpush.msrb.mxu1 %v225_v63  ;;  %334 = vmatpush.msrb.mxu2 %v239_v0 }
  0x39   :  { %356 = vmatpush.msrb.mxu3 %v256_v1  ;;  %288 = vmatpush.msrb.mxu0 %v207_v2 }
  0x3a   :  { %310 = vmatpush.msrb.mxu1 %v224_v3  ;;  %335 = vmatpush.msrb.mxu2 %v238_v4 }
  0x3b   :  { %357 = vmatpush.msrb.mxu3 %v255_v5  ;;  %289 = vmatpush.msrb.mxu0 %v206_v6 }
  0x3c   :  { %311 = vmatpush.msrb.mxu1 %v223_v7 }
  0x3d   :  { %358 = vmatpush.msrb.mxu3 %v254_v8 }
  0x3e   :  { %312 = vmatpush.msrb.mxu1 %v222_v9 }
  0x97   :  { %v123_v13 = vpop.f32.mrf.mxu0 }
  0x98   :  { %v124_v15 = vadd.f32 %v123_v13, %v91_v11 }
  0x99   :  { %v146_v17 = vpop.f32.mrf.mxu1 }
  0x9a   :  { %v198_v18 = vmax.f32 %v124_v15, 0.0  ;;  %v147_v19 = vadd.f32 %v146_v17, %v92_v12 }
  0x9b   :  { %v169_v20 = vpop.f32.mrf.mxu2  ;;  %v192_v21 = vpop.f32.mrf.mxu3 }
  0x9c   :  { %v170_v22 = vadd.f32 %v169_v20, %v93_v14  ;;  %v193_v23 = vadd.f32 %v192_v21, %v94_v16  ;;  %v199_v24 = vmax.f32 %v147_v19, 0.0  ;;  %290 = vmatmul.f32.vlgmr.msrb.gmra.mxu0 %v198_v18 }
  0x9e   :  { %v200_v25 = vmax.f32 %v170_v22, 0.0  ;;  %v201_v26 = vmax.f32 %v193_v23, 0.0  ;;  %313 = vmatmul.f32.vlgmr.msrb.gmra.mxu1 %v199_v24 }
  0x9f   :  { %v126_v27 = vpop.f32.mrf.mxu0 }
  0xa0   :  { %336 = vmatmul.f32.vlgmr.msrb.gmra.mxu2 %v200_v25  ;;  %359 = vmatmul.f32.vlgmr.msrb.gmra.mxu3 %v201_v26  ;;  %v127_v28 = vadd.f32 %v126_v27, %v91_v11 }
  0xa1   :  { %v149_v29 = vpop.f32.mrf.mxu1 }
  0xa2   :  { %v202_v30 = vmax.f32 %v127_v28, 0.0  ;;  %v150_v31 = vadd.f32 %v149_v29, %v92_v12 }
  0xa3   :  { %v172_v32 = vpop.f32.mrf.mxu2  ;;  %v195_v33 = vpop.f32.mrf.mxu3 }
  0xa4   :  { %v173_v34 = vadd.f32 %v172_v32, %v93_v14  ;;  %v196_v35 = vadd.f32 %v195_v33, %v94_v16  ;;  %v203_v36 = vmax.f32 %v150_v31, 0.0  ;;  %293 = vmatmul.f32.gmra.mxu0 %v202_v30 }
  0xa6   :  { %v204_v37 = vmax.f32 %v173_v34, 0.0  ;;  %v205_v38 = vmax.f32 %v196_v35, 0.0  ;;  %316 = vmatmul.f32.gmra.mxu1 %v203_v36 }
  0xa8   :  { %339 = vmatmul.f32.gmra.mxu2 %v204_v37  ;;  %362 = vmatmul.f32.gmra.mxu3 %v205_v38 }
 0x119   :  { %v291_v40 = vpop.f32.mrf.mxu0 }
 0x11a   :  { %v292_v42 = vadd.f32 %v406_v39, %v291_v40 }
 0x11b   :  { %v314_v41 = vpop.f32.mrf.mxu1 }
 0x11c   :  { %v315_v43 = vadd.f32 %v314_v41, %v292_v42 }
 0x121   :  { %v294_v44 = vpop.f32.mrf.mxu0 }
 0x122   :  { %v295_v48 = vadd.f32 %v406_v39, %v294_v44 }
 0x123   :  { %v337_v45 = vpop.f32.mrf.mxu2  ;;  %v360_v46 = vpop.f32.mrf.mxu3 }
 0x124   :  { %v338_v47 = vadd.f32 %v337_v45, %v315_v43  ;;  %v317_v49 = vpop.f32.mrf.mxu1 }
 0x125   :  { %v318_v51 = vadd.f32 %v317_v49, %v295_v48 }
 0x126   :  { %v361_v50 = vadd.f32 %v360_v46, %v338_v47 }
 0x128   :  { %366 = vst [vmem:[#allocation10] sm:$0xff] %v361_v50 }
 0x12b   :  { %v340_v52 = vpop.f32.mrf.mxu2  ;;  %v363_v53 = vpop.f32.mrf.mxu3 }
 0x12c   :  { %v341_v54 = vadd.f32 %v340_v52, %v318_v51 }
 0x12e   :  { %v364_v55 = vadd.f32 %v363_v53, %v341_v54 }
 0x130   :  { %367 = vst [vmem:[#allocation10 + $0x8] sm:$0xff] %v364_v55 }
 0x131   :  { %380 = dma.vmem_to_hbm [thread:$0]  %s373_s3, 256, %s375_s13, [#allocation4], %s539_s27, %s539_s27, %s540_s28  }
 0x132   :  { %533 = dma.done.wait [#allocation4], 256  }
 0x133   :  { %534 = vsyncadd [#allocation4], 4294967040 }
 0x134   :  { %385 = vsyncpa [#allocation3], 1 }
 0x135   :  { %386 = vsyncpa [#allocation6], 1 }
 0x136   :  { %387 = vsyncpa [#allocation9], 1 }
 0x137   :  { %388 = vsyncpa [#allocation4], 1 }

// kernel: tpu_custom_call.1
= control target key start
LH: loop header
LB: loop body
LE: loop exit
PB: predicated region body
PF: predicated region fallthrough
CT: control target
= control target key end

     0   :  { %9 = vsyncpa [#allocation3], 0  ;;  %s601_s0 = inlined_call_operand.hbm [shape: f32[16,16], index: 0, kind: input, shape index: {}]   ;;  %s602_s1 = inlined_call_operand.hbm [shape: f32[16,512], index: 1, kind: input, shape index: {}]   ;;  %s603_s2 = inlined_call_operand.hbm [shape: f32[512,128], index: 2, kind: input, shape index: {}]   ;;  %s604_s3 = inlined_call_operand.hbm [shape: f32[1,640], index: 3, kind: input, shape index: {}]   ;;  %s605_s4 = inlined_call_operand.hbm [shape: f32[16,128], index: 4, kind: output, shape index: {}]  }
   0x1   :  { %10 = vsyncpa [#allocation6], 0 }
   0x2   :  { %11 = vsyncpa [#allocation9], 0  ;;  %s30_s17 = sshll.u32 %s602_s1, 4  ;;  %s31_s17 = int_to_ptr.hbm [resolvable:$true] %s30_s17 }
   0x3   :  { %12 = vsyncpa [#allocation4], 0  ;;  %s535_s18 = smov [#allocation5]   ;;  %s17_s22 = sshll.u32 %s601_s0, 4  ;;  %s18_s22 = int_to_ptr.hbm [resolvable:$true] %s17_s22 }
   0x4   :  { %s32_s19 = sshll.u32 %s535_s18, 4  ;;  %s536_s23 = smov 512   ;;  %s33_s19 = int_to_ptr.vmem [resolvable:$true] %s32_s19 }
   0x5   :  { %s537_s24 = smov 32   ;;  %s538_s25 = smov [#allocation2]  }
   0x6   :  { %38 = dma.hbm_to_vmem [thread:$0]  %s31_s17, 1024, %s33_s19, [#allocation6], %s536_s23, %s536_s23, %s537_s24  }
   0x7   :  { %s19_s26 = sshll.u32 %s538_s25, 4  ;;  %s539_s27 = smov 128   ;;  %s20_s26 = int_to_ptr.vmem [resolvable:$true] %s19_s26 }
   0x8   :  { %s540_s28 = smov 8   ;;  %s43_s30 = sshll.u32 %s603_s2, 4  ;;  %s44_s30 = int_to_ptr.hbm [resolvable:$true] %s43_s30 }
   0x9   :  { %25 = dma.hbm_to_vmem [thread:$0]  %s18_s22, 256, %s20_s26, [#allocation3], %s539_s27, %s539_s27, %s540_s28  }
   0xa   :  { %s541_s5 = smov [#allocation7]   ;;  %s57_s8 = sshll.u32 %s604_s3, 4  ;;  %s58_s8 = int_to_ptr.hbm [resolvable:$true] %s57_s8 }
   0xb   :  { %s45_s0 = sshll.u32 %s541_s5, 4  ;;  %s542_s9 = smov [#allocation8]   ;;  %s46_s0 = int_to_ptr.vmem [resolvable:$true] %s45_s0 }
   0xc   :  { %51 = dma.hbm_to_vmem [thread:$0]  %s44_s30, 8192, %s46_s0, [#allocation6], %s539_s27, %s539_s27, %s540_s28  }
   0xd   :  { %s59_s10 = sshll.u32 %s542_s9, 4  ;;  %s60_s10 = int_to_ptr.vmem [resolvable:$true] %s59_s10 }
   0xe   :  { %62 = dma.hbm_to_vmem [thread:$0]  %s58_s8, 80, %s60_s10, [#allocation9]  }
   0xf   :  { %527 = dma.done.wait [#allocation3], 256  }
  0x10   :  { %528 = vsyncadd [#allocation3], 4294967040 }
  0x11   :  { %529 = dma.done.wait [#allocation6], 9216  }
  0x12   :  { %530 = vsyncadd [#allocation6], 4294958080 }
  0x13   :  { %531 = dma.done.wait [#allocation9], 80  }
  0x14   :  { %532 = vsyncadd [#allocation9], 4294967216  ;;  %v87_v0 = vld [vmem:[#allocation5 + $0x30] sm:$0xff]  ;;  %v88_v2 = vld [vmem:[#allocation5 + $0x38] sm:$0xff]  ;;  %vm99_vm0 = vcmask 130048   ;;  %s543_s2 = smov [#allocation10]  }
  0x15   :  { %v83_v1 = vld [vmem:[#allocation5 + $0x10] sm:$0xff]  ;;  %166 = vmatpush.msra.mxu2 %v87_v0  ;;  %189 = vmatpush.msra.mxu3 %v88_v2  ;;  %v84_v4 = vld [vmem:[#allocation5 + $0x18] sm:$0xff]  ;;  %v85_v5 = vld [vmem:[#allocation5 + $0x20] sm:$0xff]  ;;  %s372_s3 = sshll.u32 %s543_s2, 4  ;;  %s374_s13 = sshll.u32 %s605_s4, 4  ;;  %s373_s3 = int_to_ptr.vmem [resolvable:$true] %s372_s3  ;;  %s375_s13 = int_to_ptr.hbm [resolvable:$true] %s374_s13 }
  0x16   :  { %v79_v3 = vld [vmem:[#allocation2] sm:$0xff]  ;;  %120 = vmatpush.msra.mxu0 %v85_v5  ;;  %v81_v6 = vld [vmem:[#allocation5] sm:$0xff]  ;;  %v86_v7 = vld [vmem:[#allocation5 + $0x28] sm:$0xff] }
  0x17   :  { %167 = vmatpush.msra.mxu2 %v83_v1  ;;  %190 = vmatpush.msra.mxu3 %v84_v4  ;;  %v253_v8 = vld [vmem:[#allocation7 + $0x178] sm:$0xff]  ;;  %v82_v9 = vld [vmem:[#allocation5 + $0x8] sm:$0xff]  ;;  %v252_v11 = vld [vmem:[#allocation7 + $0x170] sm:$0xff] }
  0x18   :  { %393 = vmatmul.msk.f32.vlgmr.msra.gmra.mxu2 %vm99_vm0, %v79_v3  ;;  %395 = vmatmul.msk.f32.vlgmr.msra.gmra.mxu3 %vm99_vm0, %v79_v3  ;;  %v221_v10 = vld [vmem:[#allocation7 + $0x78] sm:$0xff]  ;;  %v220_v13 = vld [vmem:[#allocation7 + $0x70] sm:$0xff]  ;;  %v251_v15 = vld [vmem:[#allocation7 + $0x168] sm:$0xff] }
  0x19   :  { %121 = vmatpush.msra.mxu0 %v81_v6  ;;  %143 = vmatpush.msra.mxu1 %v86_v7  ;;  %v269_v12 = vld [vmem:[#allocation7 + $0x1f8] sm:$0xff]  ;;  %v268_v16 = vld [vmem:[#allocation7 + $0x1f0] sm:$0xff]  ;;  %v219_v17 = vld [vmem:[#allocation7 + $0x68] sm:$0xff] }
  0x1a   :  { %389 = vmatmul.msk.f32.vlgmr.msra.gmra.mxu0 %vm99_vm0, %v79_v3  ;;  %320 = vmatpush.msrb.mxu2 %v253_v8  ;;  %v237_v14 = vld [vmem:[#allocation7 + $0xf8] sm:$0xff]  ;;  %v236_v19 = vld [vmem:[#allocation7 + $0xf0] sm:$0xff]  ;;  %v250_v20 = vld [vmem:[#allocation7 + $0x160] sm:$0xff] }
  0x1b   :  { %144 = vmatpush.msra.mxu1 %v82_v9  ;;  %274 = vmatpush.msrb.mxu0 %v221_v10  ;;  %v80_v18 = vld [vmem:[#allocation2 + $0x8] sm:$0xff]  ;;  %v267_v21 = vld [vmem:[#allocation7 + $0x1e8] sm:$0xff]  ;;  %v218_v22 = vld [vmem:[#allocation7 + $0x60] sm:$0xff] }
  0x1c   :  { %391 = vmatmul.msk.f32.vlgmr.msra.gmra.mxu1 %vm99_vm0, %v79_v3  ;;  %321 = vmatpush.msrb.mxu2 %v252_v11  ;;  %v235_v23 = vld [vmem:[#allocation7 + $0xe8] sm:$0xff]  ;;  %v249_v24 = vld [vmem:[#allocation7 + $0x158] sm:$0xff]  ;;  %v266_v25 = vld [vmem:[#allocation7 + $0x1e0] sm:$0xff] }
  0x1d   :  { %343 = vmatpush.msrb.mxu3 %v269_v12  ;;  %275 = vmatpush.msrb.mxu0 %v220_v13  ;;  %v217_v26 = vld [vmem:[#allocation7 + $0x58] sm:$0xff]  ;;  %v234_v27 = vld [vmem:[#allocation7 + $0xe0] sm:$0xff]  ;;  %v248_v28 = vld [vmem:[#allocation7 + $0x150] sm:$0xff] }
  0x1e   :  { %297 = vmatpush.msrb.mxu1 %v237_v14  ;;  %322 = vmatpush.msrb.mxu2 %v251_v15  ;;  %v265_v29 = vld [vmem:[#allocation7 + $0x1d8] sm:$0xff]  ;;  %v216_v30 = vld [vmem:[#allocation7 + $0x50] sm:$0xff]  ;;  %v247_v32 = vld [vmem:[#allocation7 + $0x148] sm:$0xff] }
  0x1f   :  { %344 = vmatpush.msrb.mxu3 %v268_v16  ;;  %276 = vmatpush.msrb.mxu0 %v219_v17  ;;  %v233_v31 = vld [vmem:[#allocation7 + $0xd8] sm:$0xff]  ;;  %v264_v33 = vld [vmem:[#allocation7 + $0x1d0] sm:$0xff]  ;;  %v215_v34 = vld [vmem:[#allocation7 + $0x48] sm:$0xff] }
  0x20   :  { %394 = vmatmul.msk.f32.gmra.mxu2 %vm99_vm0, %v80_v18  ;;  %396 = vmatmul.msk.f32.gmra.mxu3 %vm99_vm0, %v80_v18  ;;  %v232_v35 = vld [vmem:[#allocation7 + $0xd0] sm:$0xff]  ;;  %v246_v36 = vld [vmem:[#allocation7 + $0x140] sm:$0xff]  ;;  %v263_v37 = vld [vmem:[#allocation7 + $0x1c8] sm:$0xff] }
  0x21   :  { %298 = vmatpush.msrb.mxu1 %v236_v19  ;;  %323 = vmatpush.msrb.mxu2 %v250_v20  ;;  %v214_v38 = vld [vmem:[#allocation7 + $0x40] sm:$0xff]  ;;  %v231_v39 = vld [vmem:[#allocation7 + $0xc8] sm:$0xff]  ;;  %v245_v40 = vld [vmem:[#allocation7 + $0x138] sm:$0xff] }
  0x22   :  { %390 = vmatmul.msk.f32.gmra.mxu0 %vm99_vm0, %v80_v18  ;;  %345 = vmatpush.msrb.mxu3 %v267_v21  ;;  %v262_v41 = vld [vmem:[#allocation7 + $0x1c0] sm:$0xff]  ;;  %v213_v42 = vld [vmem:[#allocation7 + $0x38] sm:$0xff]  ;;  %v244_v44 = vld [vmem:[#allocation7 + $0x130] sm:$0xff] }
  0x23   :  { %277 = vmatpush.msrb.mxu0 %v218_v22  ;;  %299 = vmatpush.msrb.mxu1 %v235_v23  ;;  %v230_v43 = vld [vmem:[#allocation7 + $0xc0] sm:$0xff]  ;;  %v261_v45 = vld [vmem:[#allocation7 + $0x1b8] sm:$0xff]  ;;  %v212_v46 = vld [vmem:[#allocation7 + $0x30] sm:$0xff] }
  0x24   :  { %392 = vmatmul.msk.f32.gmra.mxu1 %vm99_vm0, %v80_v18  ;;  %324 = vmatpush.msrb.mxu2 %v249_v24  ;;  %v229_v47 = vld [vmem:[#allocation7 + $0xb8] sm:$0xff]  ;;  %v243_v48 = vld [vmem:[#allocation7 + $0x128] sm:$0xff]  ;;  %v260_v49 = vld [vmem:[#allocation7 + $0x1b0] sm:$0xff] }
  0x25   :  { %346 = vmatpush.msrb.mxu3 %v266_v25  ;;  %278 = vmatpush.msrb.mxu0 %v217_v26  ;;  %v211_v50 = vld [vmem:[#allocation7 + $0x28] sm:$0xff]  ;;  %v228_v51 = vld [vmem:[#allocation7 + $0xb0] sm:$0xff]  ;;  %v242_v52 = vld [vmem:[#allocation7 + $0x120] sm:$0xff] }
  0x26   :  { %300 = vmatpush.msrb.mxu1 %v234_v27  ;;  %325 = vmatpush.msrb.mxu2 %v248_v28  ;;  %v259_v53 = vld [vmem:[#allocation7 + $0x1a8] sm:$0xff]  ;;  %v210_v54 = vld [vmem:[#allocation7 + $0x20] sm:$0xff]  ;;  %v241_v56 = vld [vmem:[#allocation7 + $0x118] sm:$0xff] }
  0x27   :  { %347 = vmatpush.msrb.mxu3 %v265_v29  ;;  %279 = vmatpush.msrb.mxu0 %v216_v30  ;;  %v227_v55 = vld [vmem:[#allocation7 + $0xa8] sm:$0xff]  ;;  %v258_v57 = vld [vmem:[#allocation7 + $0x1a0] sm:$0xff]  ;;  %v209_v58 = vld [vmem:[#allocation7 + $0x18] sm:$0xff] }
  0x28   :  { %301 = vmatpush.msrb.mxu1 %v233_v31  ;;  %326 = vmatpush.msrb.mxu2 %v247_v32  ;;  %v226_v59 = vld [vmem:[#allocation7 + $0xa0] sm:$0xff]  ;;  %v240_v60 = vld [vmem:[#allocation7 + $0x110] sm:$0xff]  ;;  %v257_v61 = vld [vmem:[#allocation7 + $0x198] sm:$0xff] }
  0x29   :  { %348 = vmatpush.msrb.mxu3 %v264_v33  ;;  %280 = vmatpush.msrb.mxu0 %v215_v34  ;;  %v208_v62 = vld [vmem:[#allocation7 + $0x10] sm:$0xff]  ;;  %v225_v63 = vld [vmem:[#allocation7 + $0x98] sm:$0xff]  ;;  %v239_v0 = vld [vmem:[#allocation7 + $0x108] sm:$0xff] }
  0x2a   :  { %302 = vmatpush.msrb.mxu1 %v232_v35  ;;  %327 = vmatpush.msrb.mxu2 %v246_v36  ;;  %v256_v1 = vld [vmem:[#allocation7 + $0x190] sm:$0xff]  ;;  %v207_v2 = vld [vmem:[#allocation7 + $0x8] sm:$0xff]  ;;  %v238_v4 = vld [vmem:[#allocation7 + $0x100] sm:$0xff] }
  0x2b   :  { %349 = vmatpush.msrb.mxu3 %v263_v37  ;;  %281 = vmatpush.msrb.mxu0 %v214_v38  ;;  %v224_v3 = vld [vmem:[#allocation7 + $0x90] sm:$0xff]  ;;  %v255_v5 = vld [vmem:[#allocation7 + $0x188] sm:$0xff]  ;;  %v206_v6 = vld [vmem:[#allocation7] sm:$0xff] }
  0x2c   :  { %303 = vmatpush.msrb.mxu1 %v231_v39  ;;  %328 = vmatpush.msrb.mxu2 %v245_v40  ;;  %v223_v7 = vld [vmem:[#allocation7 + $0x88] sm:$0xff]  ;;  %v254_v8 = vld [vmem:[#allocation7 + $0x180] sm:$0xff] }
  0x2d   :  { %350 = vmatpush.msrb.mxu3 %v262_v41  ;;  %282 = vmatpush.msrb.mxu0 %v213_v42  ;;  %v222_v9 = vld [vmem:[#allocation7 + $0x80] sm:$0xff] }
  0x2e   :  { %304 = vmatpush.msrb.mxu1 %v230_v43  ;;  %329 = vmatpush.msrb.mxu2 %v244_v44  ;;  %v89_v10 = vld [vmem:[#allocation8] sm:$0xf]  ;;  %v406_v39 = vld [vmem:[#allocation8 + $0x4] ss:$0 sm:$0xff] }
  0x2f   :  { %351 = vmatpush.msrb.mxu3 %v261_v45  ;;  %283 = vmatpush.msrb.mxu0 %v212_v46  ;;  %v91_v11 = vperm.slane %v89_v10, 0  ;;  %v92_v12 = vperm.slane %v89_v10, 1  ;;  %v93_v14 = vperm.slane %v89_v10, 2  ;;  %v94_v16 = vperm.slane %v89_v10, 3 }
  0x30   :  { %305 = vmatpush.msrb.mxu1 %v229_v47  ;;  %330 = vmatpush.msrb.mxu2 %v243_v48 }
  0x31   :  { %352 = vmatpush.msrb.mxu3 %v260_v49  ;;  %284 = vmatpush.msrb.mxu0 %v211_v50 }
  0x32   :  { %306 = vmatpush.msrb.mxu1 %v228_v51  ;;  %331 = vmatpush.msrb.mxu2 %v242_v52 }
  0x33   :  { %353 = vmatpush.msrb.mxu3 %v259_v53  ;;  %285 = vmatpush.msrb.mxu0 %v210_v54 }
  0x34   :  { %307 = vmatpush.msrb.mxu1 %v227_v55  ;;  %332 = vmatpush.msrb.mxu2 %v241_v56 }
  0x35   :  { %354 = vmatpush.msrb.mxu3 %v258_v57  ;;  %286 = vmatpush.msrb.mxu0 %v209_v58 }
  0x36   :  { %308 = vmatpush.msrb.mxu1 %v226_v59  ;;  %333 = vmatpush.msrb.mxu2 %v240_v60 }
  0x37   :  { %355 = vmatpush.msrb.mxu3 %v257_v61  ;;  %287 = vmatpush.msrb.mxu0 %v208_v62 }
  0x38   :  { %309 = vmatpush.msrb.mxu1 %v225_v63  ;;  %334 = vmatpush.msrb.mxu2 %v239_v0 }
  0x39   :  { %356 = vmatpush.msrb.mxu3 %v256_v1  ;;  %288 = vmatpush.msrb.mxu0 %v207_v2 }
  0x3a   :  { %310 = vmatpush.msrb.mxu1 %v224_v3  ;;  %335 = vmatpush.msrb.mxu2 %v238_v4 }
  0x3b   :  { %357 = vmatpush.msrb.mxu3 %v255_v5  ;;  %289 = vmatpush.msrb.mxu0 %v206_v6 }
  0x3c   :  { %311 = vmatpush.msrb.mxu1 %v223_v7 }
  0x3d   :  { %358 = vmatpush.msrb.mxu3 %v254_v8 }
  0x3e   :  { %312 = vmatpush.msrb.mxu1 %v222_v9 }
  0x97   :  { %v123_v13 = vpop.f32.mrf.mxu0 }
  0x98   :  { %v124_v15 = vadd.f32 %v123_v13, %v91_v11 }
  0x99   :  { %v146_v17 = vpop.f32.mrf.mxu1 }
  0x9a   :  { %v198_v18 = vmax.f32 %v124_v15, 0.0  ;;  %v147_v19 = vadd.f32 %v146_v17, %v92_v12 }
  0x9b   :  { %v169_v20 = vpop.f32.mrf.mxu2  ;;  %v192_v21 = vpop.f32.mrf.mxu3 }
  0x9c   :  { %v170_v22 = vadd.f32 %v169_v20, %v93_v14  ;;  %v193_v23 = vadd.f32 %v192_v21, %v94_v16  ;;  %v199_v24 = vmax.f32 %v147_v19, 0.0  ;;  %290 = vmatmul.f32.vlgmr.msrb.gmra.mxu0 %v198_v18 }
  0x9e   :  { %v200_v25 = vmax.f32 %v170_v22, 0.0  ;;  %v201_v26 = vmax.f32 %v193_v23, 0.0  ;;  %313 = vmatmul.f32.vlgmr.msrb.gmra.mxu1 %v199_v24 }
  0x9f   :  { %v126_v27 = vpop.f32.mrf.mxu0 }
  0xa0   :  { %336 = vmatmul.f32.vlgmr.msrb.gmra.mxu2 %v200_v25  ;;  %359 = vmatmul.f32.vlgmr.msrb.gmra.mxu3 %v201_v26  ;;  %v127_v28 = vadd.f32 %v126_v27, %v91_v11 }
  0xa1   :  { %v149_v29 = vpop.f32.mrf.mxu1 }
  0xa2   :  { %v202_v30 = vmax.f32 %v127_v28, 0.0  ;;  %v150_v31 = vadd.f32 %v149_v29, %v92_v12 }
  0xa3   :  { %v172_v32 = vpop.f32.mrf.mxu2  ;;  %v195_v33 = vpop.f32.mrf.mxu3 }
  0xa4   :  { %v173_v34 = vadd.f32 %v172_v32, %v93_v14  ;;  %v196_v35 = vadd.f32 %v195_v33, %v94_v16  ;;  %v203_v36 = vmax.f32 %v150_v31, 0.0  ;;  %293 = vmatmul.f32.gmra.mxu0 %v202_v30 }
  0xa6   :  { %v204_v37 = vmax.f32 %v173_v34, 0.0  ;;  %v205_v38 = vmax.f32 %v196_v35, 0.0  ;;  %316 = vmatmul.f32.gmra.mxu1 %v203_v36 }
  0xa8   :  { %339 = vmatmul.f32.gmra.mxu2 %v204_v37  ;;  %362 = vmatmul.f32.gmra.mxu3 %v205_v38 }
 0x119   :  { %v291_v40 = vpop.f32.mrf.mxu0 }
 0x11a   :  { %v292_v42 = vadd.f32 %v406_v39, %v291_v40 }
 0x11b   :  { %v314_v41 = vpop.f32.mrf.mxu1 }
 0x11c   :  { %v315_v43 = vadd.f32 %v314_v41, %v292_v42 }
 0x121   :  { %v294_v44 = vpop.f32.mrf.mxu0 }
 0x122   :  { %v295_v48 = vadd.f32 %v406_v39, %v294_v44 }
 0x123   :  { %v337_v45 = vpop.f32.mrf.mxu2  ;;  %v360_v46 = vpop.f32.mrf.mxu3 }
 0x124   :  { %v338_v47 = vadd.f32 %v337_v45, %v315_v43  ;;  %v317_v49 = vpop.f32.mrf.mxu1 }
 0x125   :  { %v318_v51 = vadd.f32 %v317_v49, %v295_v48 }
 0x126   :  { %v361_v50 = vadd.f32 %v360_v46, %v338_v47 }
 0x128   :  { %366 = vst [vmem:[#allocation10] sm:$0xff] %v361_v50 }
 0x12b   :  { %v340_v52 = vpop.f32.mrf.mxu2  ;;  %v363_v53 = vpop.f32.mrf.mxu3 }
 0x12c   :  { %v341_v54 = vadd.f32 %v340_v52, %v318_v51 }
 0x12e   :  { %v364_v55 = vadd.f32 %v363_v53, %v341_v54 }
 0x130   :  { %367 = vst [vmem:[#allocation10 + $0x8] sm:$0xff] %v364_v55 }
 0x131   :  { %380 = dma.vmem_to_hbm [thread:$0]  %s373_s3, 256, %s375_s13, [#allocation4], %s539_s27, %s539_s27, %s540_s28  }
 0x132   :  { %533 = dma.done.wait [#allocation4], 256  }
 0x133   :  { %534 = vsyncadd [#allocation4], 4294967040 }
 0x134   :  { %385 = vsyncpa [#allocation3], 1 }
 0x135   :  { %386 = vsyncpa [#allocation6], 1 }
 0x136   :  { %387 = vsyncpa [#allocation9], 1 }
 0x137   :  { %388 = vsyncpa [#allocation4], 1 }

</bundles_post_ra>
